<compile_context>
chip_gen: v7x
topology: tpu7x:2x2x1
jax: 0.10.0
libtpu: 0.0.40
codegen_flags: <defaults>
</compile_context>

<pallas_src>
import functools
import math

import numpy as np
import jax
import jax.numpy as jnp
from jax.experimental import pallas as pl
from jax.experimental.pallas import tpu as pltpu


def _round_up(v, m):
    return ((v + m - 1) // m) * m


def _vmem_limit_bytes(E, tile_m, tile_n, tile_k, C, gated, out_itemsize):
    """Rough double-buffered working-set estimate for the fused layer kernel."""
    acc = E * tile_m * tile_n * 4                      # per-expert f32 accumulators
    dbl = 2                                            # BlockSpec double buffering
    adj = dbl * tile_m * tile_k * 2
    x = dbl * tile_k * C * 2
    w = dbl * E * C * tile_n * 2
    g = dbl * tile_m * 128 * 4 if gated else 0
    b = dbl * _round_up(E, 8) * tile_n * 4
    out = dbl * tile_m * tile_n * out_itemsize
    est = acc + adj + x + w + g + b + out
    # Headroom, capped below v7x's 64 MiB physical VMEM; raises v5e's 16 MiB default.
    return int(min(48 * 1024 * 1024, max(24 * 1024 * 1024, est * 5 // 4)))


# ----------------------------------------------------------------------------
# Kernel 1: gate logits   logits = x @ w_gate   (no expert grid axis; x read once)
# ----------------------------------------------------------------------------
def _gate_logits_kernel(x_ref, w_ref, o_ref):
    o_ref[...] = jnp.dot(x_ref[...], w_ref[...], preferred_element_type=jnp.float32)


def gate_logits(x_p, wg_p, *, tile_m):
    """x_p: [Np, C] bf16, wg_p: [C, Ep] bf16  ->  [Np, Ep] f32."""
    Np, C = x_p.shape
    C2, Ep = wg_p.shape
    assert C == C2 and Np % tile_m == 0 and Ep % 128 == 0
    return pl.pallas_call(
        _gate_logits_kernel,
        out_shape=jax.ShapeDtypeStruct((Np, Ep), jnp.float32),
        grid_spec=pltpu.PrefetchScalarGridSpec(
            num_scalar_prefetch=0,
            grid=(Np // tile_m,),
            in_specs=[pl.BlockSpec((tile_m, C), lambda i: (i, 0)),
                      pl.BlockSpec((C, Ep), lambda i: (0, 0))],
            out_specs=pl.BlockSpec((tile_m, Ep), lambda i: (i, 0)),
        ),
        compiler_params=pltpu.CompilerParams(dimension_semantics=("parallel",)),
    )(x_p, wg_p)


# ----------------------------------------------------------------------------
# Kernel 2: fused per-layer kernel (GCNConv and gated MoE-of-GCNConv)
#   out = relu?( sum_e g[:, e] * (adj @ (x @ W_e) + b_e) )
#   Grid (i, j, k); k reduces over adj columns.  Per (i, j, k) step, the adj tile
#   is DMA'd once and reused by every (non-skipped) expert; h_e tiles are computed
#   on the fly from the resident [E, C, tile_n] weight slice (no h HBM traffic).
#   Gates/bias/ReLU live only in the k==last epilogue (k-invariant work hoisted).
# ----------------------------------------------------------------------------
def _fused_layer_kernel(*refs, n_experts, gated, relu):
    if gated:
        mask_ref, g_ref, a_ref, x_ref, w_ref, b_ref, o_ref, acc_ref = refs
    else:
        a_ref, x_ref, w_ref, b_ref, o_ref, acc_ref = refs
        mask_ref = g_ref = None

    i = pl.program_id(0)
    k = pl.program_id(2)

    @pl.when(k == 0)
    def _():
        acc_ref[...] = jnp.zeros_like(acc_ref)

    a = a_ref[...]                       # (tm, tk) adj tile: DMA'd once, reused by all experts
    xk = x_ref[...]                      # (tk, C)  feature rows of this k tile

    for e in range(n_experts):           # static unroll
        def _expert_update(e=e):
            # Fused feature transform: bf16 inputs, f32 MXU accumulation, bf16 intermediate.
            h_e = jnp.dot(xk, w_ref[e], preferred_element_type=jnp.float32).astype(xk.dtype)
            acc_ref[e] = acc_ref[e] + jnp.dot(a, h_e, preferred_element_type=jnp.float32)

        if gated:
            # Skip experts with no active (gate > 0) row in this row tile: both matmuls saved.
            # Skipped experts keep an exactly-zero accumulator, and their gates are zero
            # for every row of this tile, so the epilogue contribution is exactly 0.
            pl.when(mask_ref[i * n_experts + e] != 0)(_expert_update)
        else:
            _expert_update()

    @pl.when(k == pl.num_programs(2) - 1)
    def _():
        if gated:
            # Gates are k-invariant: combine over experts + bias only here.
            out = g_ref[:, 0:1] * (acc_ref[0] + b_ref[0:1, :])
            for e in range(1, n_experts):
                out = out + g_ref[:, e:e + 1] * (acc_ref[e] + b_ref[e:e + 1, :])
        else:
            out = acc_ref[0] + b_ref[0:1, :]
        if relu:
            out = jnp.maximum(out, 0.0)
        o_ref[...] = out.astype(o_ref.dtype)


def fused_gcn_layer(adj_p, x_p, w_all, bias_p, *, gates_p=None, expert_mask=None,
                    tile_m, tile_n, tile_k, relu, out_dtype):
    """adj_p: [Np, Kp] bf16, x_p: [Kp, C] bf16, w_all: [E, C, Fp] bf16,
    bias_p: [BP>=E, Fp] f32, gates_p: [Np, GP] f32 or None,
    expert_mask: [ (Np//tile_m)*E ] int32 or None  ->  [Np, Fp] out_dtype."""
    Np, Kp = adj_p.shape
    Kp2, C = x_p.shape
    E, C2, Fp = w_all.shape
    BP = bias_p.shape[0]
    assert Kp == Kp2 and C == C2 and bias_p.shape[1] == Fp
    assert Np % tile_m == 0 and Kp % tile_k == 0 and Fp % tile_n == 0

    gated = gates_p is not None
    gi, gj, gk = Np // tile_m, Fp // tile_n, Kp // tile_k
    out_isz = np.dtype(out_dtype).itemsize

    # Cost estimate: includes the h recompute FLOPs and the real re-read traffic
    # (adj re-read per j tile; x re-read per (i, j); weights re-read per (i, k)).
    flops = 2 * E * (Np * Kp * Fp + gi * Kp * C * Fp)
    bytes_accessed = (Np * Kp * 2 * gj
                      + Np * C * 2 * gi * gj
                      + E * C * Fp * 2 * gi * gk
                      + (Np * gates_p.shape[1] * 4 * gj if gated else 0)
                      + BP * Fp * 4 * gi
                      + Np * Fp * out_isz)
    cost = pl.CostEstimate(flops=flops, transcendentals=0,
                           bytes_accessed=bytes_accessed)

    kernel = functools.partial(_fused_layer_kernel, n_experts=E, gated=gated,
                               relu=relu)
    vmem_limit = _vmem_limit_bytes(E, tile_m, tile_n, tile_k, C, gated, out_isz)

    if gated:
        GP = gates_p.shape[1]
        grid_spec = pltpu.PrefetchScalarGridSpec(
            num_scalar_prefetch=1,                      # per-(row-tile, expert) activity mask
            grid=(gi, gj, gk),
            in_specs=[
                pl.BlockSpec((tile_m, GP), lambda i, j, k, m: (i, 0)),        # gates (lane-dense)
                pl.BlockSpec((tile_m, tile_k), lambda i, j, k, m: (i, k)),    # adj
                pl.BlockSpec((tile_k, C), lambda i, j, k, m: (k, 0)),         # x rows for k tile
                pl.BlockSpec((E, C, tile_n), lambda i, j, k, m: (0, 0, j)),   # expert weights
                pl.BlockSpec((BP, tile_n), lambda i, j, k, m: (0, j)),        # expert biases
            ],
            out_specs=pl.BlockSpec((tile_m, tile_n), lambda i, j, k, m: (i, j)),
            scratch_shapes=[pltpu.VMEM((E, tile_m, tile_n), jnp.float32)],
        )
        args = (expert_mask, gates_p, adj_p, x_p, w_all, bias_p)
    else:
        grid_spec = pltpu.PrefetchScalarGridSpec(
            num_scalar_prefetch=0,
            grid=(gi, gj, gk),
            in_specs=[
                pl.BlockSpec((tile_m, tile_k), lambda i, j, k: (i, k)),       # adj
                pl.BlockSpec((tile_k, C), lambda i, j, k: (k, 0)),            # x rows for k tile
                pl.BlockSpec((E, C, tile_n), lambda i, j, k: (0, 0, j)),      # weight (E == 1)
                pl.BlockSpec((BP, tile_n), lambda i, j, k: (0, j)),           # bias
            ],
            out_specs=pl.BlockSpec((tile_m, tile_n), lambda i, j, k: (i, j)),
            scratch_shapes=[pltpu.VMEM((E, tile_m, tile_n), jnp.float32)],
        )
        args = (adj_p, x_p, w_all, bias_p)

    return pl.pallas_call(
        kernel,
        out_shape=jax.ShapeDtypeStruct((Np, Fp), out_dtype),
        grid_spec=grid_spec,
        compiler_params=pltpu.CompilerParams(
            dimension_semantics=("parallel", "parallel", "arbitrary"),
            vmem_limit_bytes=vmem_limit),
        cost_estimate=cost,
    )(*args)


# ----------------------------------------------------------------------------
# Parameter packing helpers (small tensors; done per layer in plain JAX)
# ----------------------------------------------------------------------------
def _prep_weights(W_list, C, Fp):
    """Per-expert GCNConv weights [out, in] -> stacked [E, C, Fp] bf16 (W^T, padded).
    Padded input columns multiply exactly-zero padded x features, so results match."""
    w = jnp.stack([w_e.T for w_e in W_list], axis=0)            # [E, in, out]
    _, in_dim, out_dim = w.shape
    w = jnp.pad(w, ((0, 0), (0, C - in_dim), (0, Fp - out_dim)))
    return w.astype(jnp.bfloat16)


def _prep_bias(b_list, Fp):
    b = jnp.stack(b_list, axis=0)                               # [E, out]
    E, out_dim = b.shape
    b = jnp.pad(b, ((0, _round_up(E, 8) - E), (0, Fp - out_dim)))
    return b.astype(jnp.float32)


# ----------------------------------------------------------------------------
# Model pieces
# ----------------------------------------------------------------------------
def cv_squared(v, eps=1e-10):
    # torch: x.var() / (x.mean()**2 + eps), unbiased variance; 0 if single element.
    if v.shape[0] == 1:
        return jnp.float32(0.0)
    mean = jnp.mean(v)
    var = jnp.sum((v - mean) ** 2) / (v.shape[0] - 1)
    return var / (mean ** 2 + eps)


def gcn_conv_pallas(x_p, adj_p, W, b, *, relu, out_dtype,
                    tile_m, tile_k, tile_feat):
    """Plain GCNConv(normalize=False): adj @ (x @ W^T) + b, ungated template (E=1).
    NOTE: padded rows pick up relu(bias); padded adj *columns* are zero so they never
    contaminate real nodes, and the final slice removes them (keep this invariant if
    a block-sparse adj version is added)."""
    Np, C = x_p.shape
    out_dim = W.shape[0]
    tn = min(tile_feat, _round_up(out_dim, 128))
    Fp = _round_up(out_dim, tn)
    w_all = _prep_weights([W], C, Fp)                           # [1, C, Fp]
    b_all = _prep_bias([b], Fp)                                 # [8, Fp]
    return fused_gcn_layer(adj_p, x_p, w_all, b_all,
                           tile_m=tile_m, tile_n=tn, tile_k=tile_k,
                           relu=relu, out_dtype=out_dtype)


def moe_layer_pallas(x_p, adj_p, n_real, layer, k, coef, *,
                     tile_m, tile_k, tile_feat):
    experts = layer["experts"]
    E = len(experts)
    Np, C = x_p.shape
    out_dim = experts[0]["W"].shape[0]

    # ---- noisy top-k gating (eval mode: no noise) ----
    wg = layer["w_gate"]                                        # [hid, E]
    Ep = _round_up(E, 128)
    wg_p = jnp.pad(wg, ((0, C - wg.shape[0]), (0, Ep - E))).astype(jnp.bfloat16)
    logits = gate_logits(x_p, wg_p, tile_m=tile_m)[:n_real, :E]

    kk = min(k + 1, E)
    top_logits, top_idx = jax.lax.top_k(logits, kk)             # routing glue (plain JAX)
    top_k_gates = jax.nn.softmax(top_logits[:, :k], axis=1)
    gates = jnp.sum(jax.nn.one_hot(top_idx[:, :k], E, dtype=jnp.float32)
                    * top_k_gates[:, :, None], axis=1)          # [n_real, E]

    importance = gates.sum(0)
    load = (gates > 0).sum(0).astype(jnp.float32)
    loss = coef * (cv_squared(importance) + cv_squared(load))

    # ---- experts: ONE fused kernel (in-kernel feature transform + gated aggregation) ----
    tn = min(tile_feat, _round_up(out_dim, 128))
    Fp = _round_up(out_dim, tn)
    w_all = _prep_weights([p["W"] for p in experts], C, Fp)     # [E, C, Fp]
    b_all = _prep_bias([p["b"] for p in experts], Fp)

    GP = _round_up(E, 128)                                      # lane-dense gates
    gates_p = jnp.pad(gates, ((0, Np - n_real), (0, GP - E)))

    # Per-(row-tile, expert) activity bitmask for in-kernel expert skipping.
    n_row_tiles = Np // tile_m
    active = jnp.pad(gates > 0.0, ((0, Np - n_real), (0, 0)))   # [Np, E]
    expert_mask = active.reshape(n_row_tiles, tile_m, E).any(axis=1)
    expert_mask = expert_mask.astype(jnp.int32).reshape(-1)     # [n_row_tiles * E]

    y = fused_gcn_layer(adj_p, x_p, w_all, b_all,
                        gates_p=gates_p, expert_mask=expert_mask,
                        tile_m=tile_m, tile_n=tn, tile_k=tile_k,
                        relu=True, out_dtype=jnp.bfloat16)      # ReLU fused (MoE != last layer)
    return y, loss


def gcn_spmoe_forward(x, adj, params, num_layers, k, coef,
                      *, tile_nodes=1024, tile_feat=512):
    N = x.shape[0]
    # Node-dim tile (output rows AND adj contraction).  For v7x (2 TCs) prefer a
    # configuration with >= 2 parallel grid blocks; tiny test inputs clamp to 128.
    tm = min(tile_nodes, _round_up(N, 128))
    tk = tm
    Np = _round_up(N, tm)

    # Hoisted: pad + cast the large dense adjacency exactly once per forward pass.
    adj_p = jnp.pad(adj, ((0, Np - N), (0, Np - N))).astype(jnp.bfloat16)
    x_p = jnp.pad(x, ((0, Np - N), (0, 0))).astype(jnp.bfloat16)

    lb_loss = jnp.float32(0.0)
    for layer in params["convs"][:-1]:
        if layer["type"] == "moe":
            x_p, l = moe_layer_pallas(x_p, adj_p, N, layer, k, coef,
                                      tile_m=tm, tile_k=tk, tile_feat=tile_feat)
            lb_loss = lb_loss + l
        else:
            x_p = gcn_conv_pallas(x_p, adj_p, layer["W"], layer["b"],
                                  relu=True, out_dtype=jnp.bfloat16,
                                  tile_m=tm, tile_k=tk, tile_feat=tile_feat)
        # ReLU is fused in the kernel epilogue; F.dropout is identity in eval.
    last = params["convs"][-1]
    out = gcn_conv_pallas(x_p, adj_p, last["W"], last["b"],
                          relu=False, out_dtype=jnp.float32,
                          tile_m=tm, tile_k=tk, tile_feat=tile_feat)
    out = out[:N, :last["W"].shape[0]]
    return out, lb_loss / math.ceil((num_layers - 2) / 2)


# ----------------------------------------------------------------------------
# Pure-JAX reference (same bf16-input / f32-accumulate recipe, for correctness)
# ----------------------------------------------------------------------------
def ref_forward(x, adj, params, num_layers, k, coef):
    bf = jnp.bfloat16
    adj_b = adj.astype(bf)

    def feat(xb, W):      # bf16 inputs, f32 accumulation, bf16 intermediate
        return jnp.dot(xb, W.T.astype(bf),
                       preferred_element_type=jnp.float32).astype(bf)

    def agg(h_b, b):
        return jnp.dot(adj_b, h_b, preferred_element_type=jnp.float32) + b

    xb = x.astype(bf)
    lb = jnp.float32(0.0)
    for layer in params["convs"][:-1]:
        if layer["type"] == "moe":
            E = len(layer["experts"])
            logits = jnp.dot(xb, layer["w_gate"].astype(bf),
                             preferred_element_type=jnp.float32)
            tl, ti = jax.lax.top_k(logits, min(k + 1, E))
            tg = jax.nn.softmax(tl[:, :k], axis=1)
            gates = jnp.sum(jax.nn.one_hot(ti[:, :k], E, dtype=jnp.float32)
                            * tg[:, :, None], axis=1)
            lb = lb + coef * (cv_squared(gates.sum(0))
                              + cv_squared((gates > 0).sum(0).astype(jnp.float32)))
            outs = jnp.stack([agg(feat(xb, p["W"]), p["b"])
                              for p in layer["experts"]], axis=0)     # [E, N, H]
            xf = jnp.einsum("ne,enh->nh", gates, outs)
        else:
            xf = agg(feat(xb, layer["W"]), layer["b"])
        xb = jnp.maximum(xf, 0.0).astype(bf)
    last = params["convs"][-1]
    out = agg(feat(xb, last["W"]), last["b"])
    return out, lb / math.ceil((num_layers - 2) / 2)


# ----------------------------------------------------------------------------
# Deterministic parameter init (shapes follow the module's __init__)
# ----------------------------------------------------------------------------
def init_params(key, in_c, hid, out_c, num_layers, num_experts):
    keys = iter(jax.random.split(key, 64))

    def glorot(kk, shape):  # PyG glorot for GCNConv weight, stored [out, in]
        fan_out, fan_in = shape
        lim = jnp.sqrt(6.0 / (fan_in + fan_out))
        return jax.random.uniform(kk, shape, jnp.float32, -lim, lim)

    def gcn_params(ci, co):
        return {"type": "gcn",
                "W": glorot(next(keys), (co, ci)),
                "b": jnp.zeros((co,), jnp.float32)}   # PyG GCNConv bias init = zeros

    convs = [gcn_params(in_c, hid)]
    for layer_idx in range(num_layers - 2):
        if layer_idx % 2 == 0:
            # NOTE: the torch module inits w_gate to zeros; small random values are
            # used here so the top-k routing path is actually exercised.
            convs.append({
                "type": "moe",
                "experts": [gcn_params(hid, hid) for _ in range(num_experts)],
                "w_gate": 0.1 * jax.random.normal(next(keys), (hid, num_experts),
                                                  jnp.float32),
            })
        else:
            convs.append(gcn_params(hid, hid))
    convs.append(gcn_params(hid, out_c))
    return {"convs": convs}


# ----------------------------------------------------------------------------
if __name__ == "__main__":
    # Small, module-consistent shapes.
    N, IN_C, HID, OUT_C = 64, 8, 32, 16
    NUM_LAYERS, NUM_EXPERTS, K, COEF = 4, 4, 1, 0.01   # dropout unused (eval mode)

    root = jax.random.PRNGKey(0)
    k_x, k_a, k_w, k_p = jax.random.split(root, 4)

    x = jax.random.normal(k_x, (N, IN_C), jnp.float32)

    # Dense "adj_t": sparse random weighted graph with self loops.
    mask = (jax.random.uniform(k_a, (N, N)) < 0.1).astype(jnp.float32)
    weights = jax.random.uniform(k_w, (N, N), jnp.float32, 0.1, 1.0)
    adj = mask * weights + jnp.eye(N, dtype=jnp.float32)

    params = init_params(k_p, IN_C, HID, OUT_C, NUM_LAYERS, NUM_EXPERTS)

    out, lb_loss = gcn_spmoe_forward(x, adj, params, NUM_LAYERS, K, COEF)
    out = jax.block_until_ready(out)
    lb_loss = jax.block_until_ready(lb_loss)

    ref_out, ref_lb = ref_forward(x, adj, params, NUM_LAYERS, K, COEF)
    assert out.shape == (N, OUT_C)
    # NOTE: bf16 adj / bf16 intermediates match this reference but drift from an
    # f32 PyTorch run; the 2e-2 tolerance reflects that deliberate precision choice.
    assert jnp.allclose(out, ref_out, rtol=2e-2, atol=2e-2), "output mismatch"
    assert jnp.allclose(lb_loss, ref_lb, rtol=1e-3, atol=1e-5), "load-balance loss mismatch"

    # TODO(synk): dropout and noisy-gating noise are training-time only (identity in eval),
    # so they are intentionally omitted.
    print("KERNEL_OK")
</pallas_src>

<mosaic_0001>
module attributes {stable_mosaic.version = 11 : i64} {
  func.func @_fused_layer_kernel(%arg0: i32, %arg1: i32, %arg2: i32, %arg3: memref<128x128xbf16, #tpu.memory_space<vmem>>, %arg4: memref<128x8xbf16, #tpu.memory_space<vmem>>, %arg5: memref<1x8x128xbf16, #tpu.memory_space<vmem>>, %arg6: memref<8x128xf32, #tpu.memory_space<vmem>>, %arg7: memref<128x128xbf16, #tpu.memory_space<vmem>>, %arg8: memref<1x128x128xf32, #tpu.memory_space<vmem>>) attributes {dimension_semantics = [#tpu.dimension_semantics<parallel>, #tpu.dimension_semantics<parallel>, #tpu.dimension_semantics<arbitrary>], iteration_bounds = array<i64: 1, 1, 1>, scalar_prefetch = 0 : i64, scratch_operands = 1 : i64, tpu.core_type = #tpu.core_type<tc>, window_params = [{transform_indices = @transform_0, window_bounds = array<i64: 128, 128>}, {transform_indices = @transform_1, window_bounds = array<i64: 128, 8>}, {transform_indices = @transform_2, window_bounds = array<i64: 1, 8, 128>}, {transform_indices = @transform_3, window_bounds = array<i64: 8, 128>}, {transform_indices = @transform_4, window_bounds = array<i64: 128, 128>}]} {
    %c0_i32 = arith.constant 0 : i32
    %0 = arith.cmpi eq, %arg2, %c0_i32 : i32
    %1 = arith.extui %0 : i1 to i32
    %c0_i32_0 = arith.constant 0 : i32
    %2 = arith.cmpi ne, %1, %c0_i32_0 : i32
    scf.if %2 {
      %cst_16 = arith.constant 0.000000e+00 : f32
      %19 = vector.broadcast %cst_16 : f32 to vector<1x128x128xf32>
      %c0_17 = arith.constant 0 : index
      %c0_18 = arith.constant 0 : index
      %c0_19 = arith.constant 0 : index
      %20 = vector.load %arg8[%c0_17, %c0_18, %c0_19] : memref<1x128x128xf32, #tpu.memory_space<vmem>>, vector<1x128x128xf32>
      tpu.vector_store %arg8[%c0_17, %c0_18, %c0_19], %19 {strides = array<i32>} : memref<1x128x128xf32, #tpu.memory_space<vmem>>, vector<1x128x128xf32>,
    } else {
    }
    %c0 = arith.constant 0 : index
    %c0_1 = arith.constant 0 : index
    %3 = vector.load %arg3[%c0, %c0_1] : memref<128x128xbf16, #tpu.memory_space<vmem>>, vector<128x128xbf16>
    %c0_2 = arith.constant 0 : index
    %c0_3 = arith.constant 0 : index
    %4 = vector.load %arg4[%c0_2, %c0_3] : memref<128x8xbf16, #tpu.memory_space<vmem>>, vector<128x8xbf16>
    %c0_4 = arith.constant 0 : index
    %c0_5 = arith.constant 0 : index
    %c0_6 = arith.constant 0 : index
    %5 = vector.load %arg5[%c0_4, %c0_5, %c0_6] : memref<1x8x128xbf16, #tpu.memory_space<vmem>>, vector<1x8x128xbf16>
    %6 = vector.shape_cast %5 : vector<1x8x128xbf16> to vector<8x128xbf16>
    %cst = arith.constant dense<0.000000e+00> : vector<128x128xf32>
    %7 = tpu.matmul %4, %6, %cst {dimension_numbers = #tpu.dot_dimension_numbers<[1], [0], [0], [1], [0, 0, 1, 1], [], []>} : vector<128x8xbf16>, vector<8x128xbf16>, vector<128x128xf32> -> vector<128x128xf32>
    %8 = arith.truncf %7 : vector<128x128xf32> to vector<128x128xbf16>
    %c0_7 = arith.constant 0 : index
    %c0_8 = arith.constant 0 : index
    %c0_9 = arith.constant 0 : index
    %9 = vector.load %arg8[%c0_7, %c0_8, %c0_9] : memref<1x128x128xf32, #tpu.memory_space<vmem>>, vector<1x128x128xf32>
    %10 = vector.shape_cast %9 : vector<1x128x128xf32> to vector<128x128xf32>
    %cst_10 = arith.constant dense<0.000000e+00> : vector<128x128xf32>
    %11 = tpu.matmul %3, %8, %cst_10 {dimension_numbers = #tpu.dot_dimension_numbers<[1], [0], [0], [1], [0, 0, 1, 1], [], []>} : vector<128x128xbf16>, vector<128x128xbf16>, vector<128x128xf32> -> vector<128x128xf32>
    %12 = arith.addf %10, %11 : vector<128x128xf32>
    %c0_11 = arith.constant 0 : index
    %c0_12 = arith.constant 0 : index
    %c0_13 = arith.constant 0 : index
    %13 = vector.load %arg8[%c0_11, %c0_12, %c0_13] : memref<1x128x128xf32, #tpu.memory_space<vmem>>, vector<1x128x128xf32>
    %14 = vector.shape_cast %13 : vector<1x128x128xf32> to vector<128x128xf32>
    %15 = vector.shape_cast %12 : vector<128x128xf32> to vector<1x128x128xf32>
    tpu.vector_store %arg8[%c0_11, %c0_12, %c0_13], %15 {strides = array<i32>} : memref<1x128x128xf32, #tpu.memory_space<vmem>>, vector<1x128x128xf32>,
    %c0_i32_14 = arith.constant 0 : i32
    %16 = arith.cmpi eq, %arg2, %c0_i32_14 : i32
    %17 = arith.extui %16 : i1 to i32
    %c0_i32_15 = arith.constant 0 : i32
    %18 = arith.cmpi ne, %17, %c0_i32_15 : i32
    scf.if %18 {
      %c0_16 = arith.constant 0 : index
      %c0_17 = arith.constant 0 : index
      %c0_18 = arith.constant 0 : index
      %19 = vector.load %arg8[%c0_16, %c0_17, %c0_18] : memref<1x128x128xf32, #tpu.memory_space<vmem>>, vector<1x128x128xf32>
      %20 = vector.shape_cast %19 : vector<1x128x128xf32> to vector<128x128xf32>
      %c0_19 = arith.constant 0 : index
      %c0_20 = arith.constant 0 : index
      %21 = vector.load %arg6[%c0_19, %c0_20] : memref<8x128xf32, #tpu.memory_space<vmem>>, vector<1x128xf32>
      %22 = vector.broadcast %21 : vector<1x128xf32> to vector<128x128xf32>
      %23 = arith.addf %20, %22 : vector<128x128xf32>
      %cst_21 = arith.constant 0.000000e+00 : f32
      %24 = vector.broadcast %cst_21 : f32 to vector<128x128xf32>
      %25 = arith.maximumf %23, %24 : vector<128x128xf32>
      %26 = arith.truncf %25 : vector<128x128xf32> to vector<128x128xbf16>
      %c0_22 = arith.constant 0 : index
      %c0_23 = arith.constant 0 : index
      %27 = vector.load %arg7[%c0_22, %c0_23] : memref<128x128xbf16, #tpu.memory_space<vmem>>, vector<128x128xbf16>
      tpu.vector_store %arg7[%c0_22, %c0_23], %26 {strides = array<i32>} : memref<128x128xbf16, #tpu.memory_space<vmem>>, vector<128x128xbf16>,
    } else {
    }
    return
  }
  func.func @transform_0(%arg0: i32, %arg1: i32, %arg2: i32) -> (i32, i32) {
    %c0_i32 = arith.constant 0 : i32
    return %arg0, %arg2 : i32, i32
  }
  func.func @transform_1(%arg0: i32, %arg1: i32, %arg2: i32) -> (i32, i32) {
    %c0_i32 = arith.constant 0 : i32
    %c0_i32_0 = arith.constant 0 : i32
    return %arg2, %c0_i32 : i32, i32
  }
  func.func @transform_2(%arg0: i32, %arg1: i32, %arg2: i32) -> (i32, i32, i32) {
    %c0_i32 = arith.constant 0 : i32
    %c0_i32_0 = arith.constant 0 : i32
    %c0_i32_1 = arith.constant 0 : i32
    return %c0_i32, %c0_i32_0, %arg1 : i32, i32, i32
  }
  func.func @transform_3(%arg0: i32, %arg1: i32, %arg2: i32) -> (i32, i32) {
    %c0_i32 = arith.constant 0 : i32
    %c0_i32_0 = arith.constant 0 : i32
    return %c0_i32, %arg1 : i32, i32
  }
  func.func @transform_4(%arg0: i32, %arg1: i32, %arg2: i32) -> (i32, i32) {
    %c0_i32 = arith.constant 0 : i32
    return %arg0, %arg1 : i32, i32
  }
}

</mosaic_0001>

<bundles_post_ra>
// kernel: tpu_custom_call.1
= control target key start
LH: loop header
LB: loop body
LE: loop exit
PB: predicated region body
PF: predicated region fallthrough
CT: control target
= control target key end

     0   :  { %9 = vsyncpa [#allocation4], 0  ;;  %s980_s0 = inlined_call_operand.vmem [shape: bf16[128,128], index: 0, kind: input, shape index: {}]   ;;  %s981_s1 = inlined_call_operand.vmem [shape: bf16[128,8], index: 1, kind: input, shape index: {}]   ;;  %s982_s2 = inlined_call_operand.hbm [shape: bf16[1,8,128], index: 2, kind: input, shape index: {}]   ;;  %s983_s3 = inlined_call_operand.vmem [shape: f32[8,128], index: 3, kind: input, shape index: {}]   ;;  %s984_s4 = inlined_call_operand.hbm [shape: bf16[128,128], index: 4, kind: output, shape index: {}]  }
   0x1   :  { %10 = vsyncpa [#allocation5], 0  ;;  %s868_s15 = smov [#allocation3]   ;;  %s820_s19 = scalar_lea.hbm %s982_s2, 64 }
   0x2   :  { %s21_s16 = sshll.u32 %s868_s15, 4  ;;  %p821_p0 = scmp.ne.s32.totalorder %s982_s2, %s820_s19  ;;  %s22_s16 = int_to_ptr.vmem [resolvable:$true] %s21_s16 }
   0x3   :  { %p824_p1 = scmp.lt.u32.totalorder %s820_s19, %s982_s2 }
   0x5   :  { %p826_p2 = pnand %p824_p1, %p821_p0 }
   0x7   :  { %829 = shalt.err (!%p826_p2)
}
   0x8   :  { %s830_s24 = scalar_lea.vmem %s22_s16, 64  ;;  %p835_p4 = scmp.lt.s32.totalorder %s22_s16, %s22_s16 }
   0x9   :  { %p831_p3 = scmp.ne.s32.totalorder %s22_s16, %s830_s24  ;;  %p836_p5 = scmp.lt.s32.totalorder %s830_s24, %s830_s24 }
   0xb   :  { %p837_p6 = por %p836_p5, %p835_p4 }
   0xd   :  { %p838_p7 = pnand %p837_p6, %p831_p3 }
   0xf   :  { %841 = shalt.err (!%p838_p7)
}
  0x10   :  { %24 = dma.hbm_to_vmem [thread:$0]  %s982_s2, 64, %s22_s16, [#allocation4]  }
  0x11   :  { %864 = dma.done.wait [#allocation4], 64  }
  0x12   :  { %865 = vsyncadd [#allocation4], 4294967232  ;;  %vm149_vm0 = vcmask 1043456   ;;  %vm124_vm1 = vcmask 64512   ;;  %v83_v0 = vld [vmem:[#allocation3] sm:$0xf] }
  0x13   :  { %799 = vmatprep.subr.msk.bf16.mxu0 %vm149_vm0, %v83_v0  ;;  %v151_v1 = vsel %vm149_vm0, %v83_v0, 0  ;;  %v804_v2 = vld [vmem:[%s981_s1] sm:$0xff]   ;;  %v805_v3 = vld [vmem:[%s981_s1 + $0x8] sm:$0xff]   ;;  %v806_v4 = vld [vmem:[%s981_s1 + $0x10] sm:$0xff]  }
  0x14   :  { %734 = vmatpush3.bf16.msra.mxu0 %v151_v1  ;;  %735 = vmatprep.mubr.msk.bf16.mxu0 %vm124_vm1, %v804_v2  ;;  %v807_v5 = vld [vmem:[%s981_s1 + $0x18] sm:$0xff]   ;;  %v808_v6 = vld [vmem:[%s981_s1 + $0x20] sm:$0xff]   ;;  %v809_v7 = vld [vmem:[%s981_s1 + $0x28] sm:$0xff]  }
  0x15   :  { %v810_v8 = vld [vmem:[%s981_s1 + $0x30] sm:$0xff]   ;;  %v811_v9 = vld [vmem:[%s981_s1 + $0x38] sm:$0xff]   ;;  %v816_v11 = vld [vmem:[%s980_s0] sm:$0xff]  }
  0x16   :  { %v812_v10 = vld [vmem:[%s980_s0 + $0x10] sm:$0xff]   ;;  %v813_v36 = vld [vmem:[%s980_s0 + $0x18] sm:$0xff]   ;;  %v817_v37 = vld [vmem:[%s980_s0 + $0x8] sm:$0xff]  }
  0x17   :  { %736 = vmatmul.mubr.msk.bf16.vlgmr.msra.gmra.mrb[0].mxu0 %vm124_vm1, %v805_v3  ;;  %771 = vmatprep.mubr.bf16.mxu1 %v812_v10  ;;  %v814_v38 = vld [vmem:[%s980_s0 + $0x20] sm:$0xff]   ;;  %v815_v39 = vld [vmem:[%s980_s0 + $0x28] sm:$0xff]   ;;  %v818_v40 = vld [vmem:[%s980_s0 + $0x30] sm:$0xff]  }
  0x18   :  { %739 = vmatprep.mubr.msk.bf16.mxu0 %vm124_vm1, %v806_v4  ;;  %v819_v41 = vld [vmem:[%s980_s0 + $0x38] sm:$0xff]   ;;  %v628_v42 = vld [vmem:[%s983_s3] ss:$0 sm:$0xff]  ;;  %s869_s0 = smov [#allocation6]  }
  0x19   :  { %s592_s3 = sshll.u32 %s869_s0, 4  ;;  %s593_s3 = int_to_ptr.vmem [resolvable:$true] %s592_s3 }
  0x1a   :  { %s842_s6 = scalar_lea.vmem %s593_s3, 1024  ;;  %p847_p9 = scmp.lt.s32.totalorder %s593_s3, %s593_s3 }
  0x1b   :  { %p843_p8 = scmp.ne.s32.totalorder %s593_s3, %s842_s6  ;;  %p848_p10 = scmp.lt.s32.totalorder %s842_s6, %s842_s6 }
  0x1d   :  { %p849_p11 = por %p848_p10, %p847_p9 }
  0x1f   :  { %740 = vmatmul.mubr.msk.bf16.gmra.mrb[4].mxu0 %vm124_vm1, %v807_v5  ;;  %p850_p12 = pnand %p849_p11, %p843_p8 }
  0x20   :  { %743 = vmatprep.mubr.msk.bf16.mxu0 %vm124_vm1, %v808_v6 }
  0x27   :  { %744 = vmatmul.mubr.msk.bf16.gmra.mrb[8].mxu0 %vm124_vm1, %v809_v7 }
  0x28   :  { %747 = vmatprep.mubr.msk.bf16.mxu0 %vm124_vm1, %v810_v8 }
  0x2f   :  { %748 = vmatmul.mubr.msk.bf16.gmra.mrb[12].mxu0 %vm124_vm1, %v811_v9 }
  0x30   :  { %767 = vmatprep.mubr.bf16.mxu0 %v816_v11 }
  0xea   :  { %v737_v12 = vpop.f32.mrb[0].mxu0 }
  0xeb   :  { %v187_v13 = vpop.f32.mrb[1].mxu0 }
  0xec   :  { %v738_v14 = vpop.f32.mrb[2].mxu0 }
  0xed   :  { %v251_v15 = vpack.c.bf16 %v738_v14, %v737_v12  ;;  %v190_v16 = vpop.f32.mrb[3].mxu0 }
  0xee   :  { %v250_v17 = vpack.c.bf16 %v190_v16, %v187_v13 }
  0xf0   :  { %751 = vmatprep.subr.bf16.mxu0 %v250_v17  ;;  %783 = vmatprep.subr.bf16.mxu1 %v250_v17 }
  0xf1   :  { %752 = vmatpush3.bf16.msra.mxu0 %v250_v17  ;;  %791 = vmatpush3.bf16.msra.mxu1 %v250_v17 }
  0xf2   :  { %v741_v18 = vpop.f32.mrb[4].mxu0  ;;  %753 = vmatprep.subr.bf16.mxu0 %v251_v15  ;;  %784 = vmatprep.subr.bf16.mxu1 %v251_v15 }
  0xf3   :  { %v203_v19 = vpop.f32.mrb[5].mxu0 }
  0xf4   :  { %v742_v20 = vpop.f32.mrb[6].mxu0 }
  0xf5   :  { %v253_v21 = vpack.c.bf16 %v742_v20, %v741_v18  ;;  %v206_v22 = vpop.f32.mrb[7].mxu0  ;;  %754 = vmatpush3.bf16.msra.mxu0 %v251_v15  ;;  %792 = vmatpush3.bf16.msra.mxu1 %v251_v15 }
  0xf6   :  { %v252_v23 = vpack.c.bf16 %v206_v22, %v203_v19 }
  0xf8   :  { %755 = vmatprep.subr.bf16.mxu0 %v252_v23  ;;  %785 = vmatprep.subr.bf16.mxu1 %v252_v23 }
  0xf9   :  { %756 = vmatpush3.bf16.msra.mxu0 %v252_v23  ;;  %793 = vmatpush3.bf16.msra.mxu1 %v252_v23 }
  0xfa   :  { %v745_v24 = vpop.f32.mrb[8].mxu0  ;;  %757 = vmatprep.subr.bf16.mxu0 %v253_v21  ;;  %786 = vmatprep.subr.bf16.mxu1 %v253_v21 }
  0xfb   :  { %v219_v25 = vpop.f32.mrb[9].mxu0 }
  0xfc   :  { %v746_v26 = vpop.f32.mrb[10].mxu0 }
  0xfd   :  { %v255_v27 = vpack.c.bf16 %v746_v26, %v745_v24  ;;  %v222_v28 = vpop.f32.mrb[11].mxu0  ;;  %758 = vmatpush3.bf16.msra.mxu0 %v253_v21  ;;  %794 = vmatpush3.bf16.msra.mxu1 %v253_v21 }
  0xfe   :  { %v254_v29 = vpack.c.bf16 %v222_v28, %v219_v25 }
 0x100   :  { %759 = vmatprep.subr.bf16.mxu0 %v254_v29  ;;  %787 = vmatprep.subr.bf16.mxu1 %v254_v29 }
 0x101   :  { %760 = vmatpush3.bf16.msra.mxu0 %v254_v29  ;;  %795 = vmatpush3.bf16.msra.mxu1 %v254_v29 }
 0x102   :  { %v749_v30 = vpop.f32.mrb[12].mxu0  ;;  %761 = vmatprep.subr.bf16.mxu0 %v255_v27  ;;  %788 = vmatprep.subr.bf16.mxu1 %v255_v27 }
 0x103   :  { %v235_v31 = vpop.f32.mrb[13].mxu0 }
 0x104   :  { %v750_v32 = vpop.f32.mrb[14].mxu0 }
 0x105   :  { %v257_v33 = vpack.c.bf16 %v750_v32, %v749_v30  ;;  %v238_v34 = vpop.f32.mrb[15].mxu0  ;;  %762 = vmatpush3.bf16.msra.mxu0 %v255_v27  ;;  %796 = vmatpush3.bf16.msra.mxu1 %v255_v27 }
 0x106   :  { %v256_v35 = vpack.c.bf16 %v238_v34, %v235_v31 }
 0x108   :  { %763 = vmatprep.subr.bf16.mxu0 %v256_v35  ;;  %789 = vmatprep.subr.bf16.mxu1 %v256_v35 }
 0x109   :  { %764 = vmatpush3.bf16.msra.mxu0 %v256_v35  ;;  %797 = vmatpush3.bf16.msra.mxu1 %v256_v35 }
 0x10a   :  { %765 = vmatprep.subr.bf16.mxu0 %v257_v33  ;;  %790 = vmatprep.subr.bf16.mxu1 %v257_v33 }
 0x10d   :  { %766 = vmatpush3.bf16.msra.mxu0 %v257_v33  ;;  %798 = vmatpush3.bf16.msra.mxu1 %v257_v33 }
 0x110   :  { %772 = vmatmul.mubr.bf16.vlgmr.msra.gmra.mrb[0].mxu1 %v813_v36  ;;  %768 = vmatmul.mubr.bf16.vlgmr.msra.gmra.mrb[16].mxu0 %v817_v37 }
 0x111   :  { %775 = vmatprep.mubr.bf16.mxu1 %v814_v38 }
 0x118   :  { %776 = vmatmul.mubr.bf16.gmra.mrb[4].mxu1 %v815_v39 }
 0x119   :  { %779 = vmatprep.mubr.bf16.mxu1 %v818_v40 }
 0x120   :  { %780 = vmatmul.mubr.bf16.gmra.mrb[8].mxu1 %v819_v41 }
 0x1e3   :  { %v773_v43 = vpop.f32.mrb[0].mxu1  ;;  %v769_v44 = vpop.f32.mrb[16].mxu0 }
 0x1e4   :  { %v481_v45 = vadd.f32 %v773_v43, %v628_v42  ;;  %v372_v46 = vpop.f32.mrb[1].mxu1  ;;  %v477_v47 = vadd.f32 %v769_v44, %v628_v42  ;;  %v356_v48 = vpop.f32.mrb[17].mxu0 }
 0x1e5   :  { %v479_v49 = vadd.f32 %v628_v42, %v372_v46  ;;  %v774_v50 = vpop.f32.mrb[2].mxu1  ;;  %v475_v51 = vadd.f32 %v628_v42, %v356_v48  ;;  %v770_v52 = vpop.f32.mrb[18].mxu0 }
 0x1e6   :  { %v482_v53 = vadd.f32 %v774_v50, %v628_v42  ;;  %v375_v54 = vpop.f32.mrb[3].mxu1  ;;  %v493_v55 = vmax.f32 %v477_v47, 0.0  ;;  %v478_v56 = vadd.f32 %v770_v52, %v628_v42  ;;  %v359_v57 = vpop.f32.mrb[19].mxu0  ;;  %v497_v61 = vmax.f32 %v481_v45, 0.0 }
 0x1e7   :  { %v480_v58 = vadd.f32 %v628_v42, %v375_v54  ;;  %v491_v59 = vmax.f32 %v475_v51, 0.0  ;;  %v476_v60 = vadd.f32 %v628_v42, %v359_v57  ;;  %v495_v0 = vmax.f32 %v479_v49, 0.0 }
 0x1e8   :  { %v498_v62 = vmax.f32 %v482_v53, 0.0  ;;  %v494_v63 = vmax.f32 %v478_v56, 0.0 }
 0x1e9   :  { %v496_v1 = vmax.f32 %v480_v58, 0.0  ;;  %v492_v2 = vmax.f32 %v476_v60, 0.0 }
 0x1ea   :  { %v679_v3 = vpack.c.bf16 %v498_v62, %v497_v61  ;;  %v669_v4 = vpack.c.bf16 %v494_v63, %v493_v55 }
 0x1eb   :  { %v674_v5 = vpack.c.bf16 %v496_v1, %v495_v0  ;;  %v777_v6 = vpop.f32.mrb[4].mxu1  ;;  %v664_v7 = vpack.c.bf16 %v492_v2, %v491_v59 }
 0x1ec   :  { %703 = vst [vmem:[#allocation6 + $0x18] sm:$0xff] %v679_v3   ;;  %v485_v8 = vadd.f32 %v777_v6, %v628_v42  ;;  %v388_v9 = vpop.f32.mrb[5].mxu1  ;;  %701 = vst [vmem:[#allocation6 + $0x8] sm:$0xff] %v669_v4  }
 0x1ed   :  { %702 = vst [vmem:[#allocation6 + $0x10] sm:$0xff] %v674_v5   ;;  %v483_v10 = vadd.f32 %v628_v42, %v388_v9  ;;  %v778_v11 = vpop.f32.mrb[6].mxu1  ;;  %665 = vst [vmem:[#allocation6] sm:$0xff] %v664_v7  }
 0x1ee   :  { %v486_v12 = vadd.f32 %v778_v11, %v628_v42  ;;  %v391_v13 = vpop.f32.mrb[7].mxu1  ;;  %v501_v15 = vmax.f32 %v485_v8, 0.0 }
 0x1ef   :  { %v484_v14 = vadd.f32 %v628_v42, %v391_v13  ;;  %v499_v17 = vmax.f32 %v483_v10, 0.0 }
 0x1f0   :  { %v502_v16 = vmax.f32 %v486_v12, 0.0 }
 0x1f1   :  { %v500_v18 = vmax.f32 %v484_v14, 0.0 }
 0x1f2   :  { %v689_v19 = vpack.c.bf16 %v502_v16, %v501_v15 }
 0x1f3   :  { %v684_v20 = vpack.c.bf16 %v500_v18, %v499_v17  ;;  %v781_v21 = vpop.f32.mrb[8].mxu1 }
 0x1f4   :  { %705 = vst [vmem:[#allocation6 + $0x28] sm:$0xff] %v689_v19   ;;  %v489_v22 = vadd.f32 %v781_v21, %v628_v42  ;;  %v404_v23 = vpop.f32.mrb[9].mxu1 }
 0x1f5   :  { %704 = vst [vmem:[#allocation6 + $0x20] sm:$0xff] %v684_v20   ;;  %v487_v24 = vadd.f32 %v628_v42, %v404_v23  ;;  %v782_v25 = vpop.f32.mrb[10].mxu1 }
 0x1f6   :  { %v490_v26 = vadd.f32 %v782_v25, %v628_v42  ;;  %v407_v27 = vpop.f32.mrb[11].mxu1  ;;  %v505_v29 = vmax.f32 %v489_v22, 0.0 }
 0x1f7   :  { %v488_v28 = vadd.f32 %v628_v42, %v407_v27  ;;  %v503_v31 = vmax.f32 %v487_v24, 0.0 }
 0x1f8   :  { %v506_v30 = vmax.f32 %v490_v26, 0.0 }
 0x1f9   :  { %v504_v32 = vmax.f32 %v488_v28, 0.0 }
 0x1fa   :  { %v699_v33 = vpack.c.bf16 %v506_v30, %v505_v29 }
 0x1fb   :  { %v694_v34 = vpack.c.bf16 %v504_v32, %v503_v31 }
 0x1fc   :  { %707 = vst [vmem:[#allocation6 + $0x38] sm:$0xff] %v699_v33  }
 0x1fd   :  { %706 = vst [vmem:[#allocation6 + $0x30] sm:$0xff] %v694_v34  }
 0x1fe   :  { %853 = shalt.err (!%p850_p12)
}
 0x1ff   :  { %s854_s9 = scalar_lea.hbm %s984_s4, 1024 }
 0x200   :  { %p855_p13 = scmp.ne.s32.totalorder %s984_s4, %s854_s9  ;;  %p858_p0 = scmp.lt.u32.totalorder %s854_s9, %s984_s4 }
 0x202   :  { %p860_p1 = pnand %p858_p0, %p855_p13 }
 0x204   :  { %863 = shalt.err (!%p860_p1)
}
 0x205   :  { %s870_s14 = smov 64   ;;  %s871_s15 = smov 4  }
 0x206   :  { %598 = dma.vmem_to_hbm [thread:$0]  %s593_s3, 1024, %s984_s4, [#allocation5], %s870_s14, %s870_s14, %s871_s15  }
 0x207   :  { %866 = dma.done.wait [#allocation5], 1024  }
 0x208   :  { %867 = vsyncadd [#allocation5], 4294966272 }
 0x209   :  { %602 = vsyncpa [#allocation4], 1 }
 0x20a   :  { %603 = vsyncpa [#allocation5], 1 }

</bundles_post_ra>
